<compile_context>
chip_gen: v6e
topology: v6e:2x2x1
jax: 0.10.0
libtpu: 0.0.40
codegen_flags: <defaults>
</compile_context>

<pallas_src>
import functools

import jax
import jax.numpy as jnp
import numpy as np
from jax.experimental import pallas as pl
from jax.experimental.pallas import tpu as pltpu


# --------------------------------------------------------------------------- helpers
def _nearest_src_indices(out_size: int, in_size: int) -> np.ndarray:
    """PyTorch F.interpolate(mode='nearest') source indices (static, numpy)."""
    # ATen: src = floor(dst * scale), scale = in/out computed in float32.
    scale = np.float32(in_size) / np.float32(out_size)
    src = np.floor(np.arange(out_size, dtype=np.float32) * scale).astype(np.int64)
    return np.clip(src, 0, in_size - 1)


def _w_selector(col_src: np.ndarray, w_in: int, dtype) -> jnp.ndarray:
    """(W_in, n_cols) one-hot selector so that x @ S gives x[:, col_src]."""
    n_cols = len(col_src)
    sel = np.zeros((w_in, n_cols), dtype=np.float32)
    sel[col_src, np.arange(n_cols)] = 1.0
    return jnp.asarray(sel, dtype=dtype)


def _row_runs(hi: np.ndarray):
    """Group output rows into static runs (for the general, non-folded path).

    Returns tuple of (oh_start, length, src_start, mode):
      'bcast': output rows [oh, oh+len) all copy input row src_start
      'copy' : output rows [oh, oh+len) copy input rows [src, src+len)
    """
    runs = []
    n = len(hi)
    i = 0
    while i < n:
        j = i + 1
        while j < n and hi[j] == hi[i]:
            j += 1
        if j - i > 1:
            runs.append((i, j - i, int(hi[i]), "bcast"))
            i = j
            continue
        j = i + 1
        while j < n and hi[j] == hi[j - 1] + 1:
            j += 1
        runs.append((i, j - i, int(hi[i]), "copy"))
        i = j
    return tuple(runs)


def _vmem_limits():
    """Generation-aware (per-step concurrent VMEM budget, vmem_limit_bytes)."""
    cap = 64 * 1024 * 1024  # conservative fallback = v7x physical per-TC VMEM
    try:
        cap = int(pltpu.get_tpu_info().vmem_capacity_bytes)
    except Exception:
        pass
    # 128 MiB parts (v5e/v6e) -> 96 MiB limit; 64 MiB parts (v7x) -> 48 MiB limit.
    limit = min((cap * 3) // 4, 96 * 1024 * 1024)
    budget = (limit * 3) // 5  # headroom for compiler-internal scratch
    return budget, limit


def _pick_block(nc: int, per_img_bytes: int, sel_bytes: int, budget: int) -> int:
    """Largest per-step image count that fits the budget, keeping >= min(nc,4) steps."""
    avail = budget - 2 * sel_bytes  # selector is double-buffered by the auto-pipeline
    b = avail // max(per_img_bytes, 1) if avail > per_img_bytes else 1
    b = max(1, min(int(b), nc))
    # >= min(nc,4) grid steps: lets v7x's 2 TensorCores split the 'parallel' axis and
    # gives the double-buffered pipeline work to overlap (no effect on tiny nc).
    min_steps = min(nc, 4)
    b = min(b, pl.cdiv(nc, min_steps))
    return int(b)


# --------------------------------------------------------------------------- kernels
def _interp_kernel_fold(x_ref, sel_ref, o_ref):
    # x_ref  : (B, H_in, W_in)      block of folded (N*C) images
    # sel_ref: (W_in, s*W_out)      one-hot W selector, tiled s times (H map folded in)
    # o_ref  : (B, H_in, s*W_out)   == contiguous (B, H_out, W_out) slab, lane-dense
    B, H_in, W_in = x_ref.shape
    W_cols = o_ref.shape[2]
    xb = x_ref[...]
    if xb.dtype != sel_ref.dtype:
        xb = xb.astype(sel_ref.dtype)  # in-kernel cast for int / fp16 inputs
    t = jnp.dot(xb.reshape(B * H_in, W_in), sel_ref[...],
                preferred_element_type=jnp.float32)
    # One-hot selection copies values exactly -> downcast / int cast is lossless.
    o_ref[...] = t.astype(o_ref.dtype).reshape(B, H_in, W_cols)


def _interp_kernel_general(x_ref, sel_ref, o_ref, *, row_runs):
    # Fallback (non-integer H ratio / downsample): W selection matmul on all input rows,
    # then statically unrolled sublane broadcasts/copies for the H axis.
    B, H_in, W_in = x_ref.shape
    W_out = o_ref.shape[2]
    xb = x_ref[...]
    if xb.dtype != sel_ref.dtype:
        xb = xb.astype(sel_ref.dtype)
    t = jnp.dot(xb.reshape(B * H_in, W_in), sel_ref[...],
                preferred_element_type=jnp.float32)
    t = t.astype(o_ref.dtype).reshape(B, H_in, W_out)
    # TODO(synk): for downsampling, gather only the needed H rows *before* the matmul,
    # and for very large non-integer H_out tile H_out into the grid instead of unrolling.
    for oh, length, src, mode in row_runs:
        if mode == "bcast":
            o_ref[:, oh:oh + length, :] = jnp.broadcast_to(
                t[:, src:src + 1, :], (B, length, W_out))
        else:  # 'copy'
            o_ref[:, oh:oh + length, :] = t[:, src:src + length, :]


# --------------------------------------------------------------------------- wrapper
def interpolate_nearest(x: jnp.ndarray, size) -> jnp.ndarray:
    """Nearest-neighbor interpolate for NCHW input, matching F.interpolate(x, size=size)."""
    if isinstance(size, int):
        size = (size, size)
    H_out, W_out = int(size[0]), int(size[1])
    N, C, H_in, W_in = x.shape
    NC = N * C
    orig_dtype = x.dtype

    # TPU has no native 64-bit path; narrow in the wrapper.
    # TODO(synk): exact only for values representable in f32 / int32.
    if x.dtype.itemsize == 8:
        x = x.astype(jnp.float32 if jnp.issubdtype(x.dtype, jnp.floating) else jnp.int32)

    # One-hot selection matmul runs in bf16 (bf16 inputs) or f32 (everything else);
    # integer / fp16 blocks are cast in-kernel so HBM traffic stays in the native dtype.
    compute_dtype = jnp.bfloat16 if x.dtype == jnp.bfloat16 else jnp.float32
    needs_cast = x.dtype not in (jnp.bfloat16, jnp.float32)
    # TODO(synk): int8/uint8 could use the integer MXU directly on v5e/v6e.

    hi = _nearest_src_indices(H_out, H_in)
    wi = _nearest_src_indices(W_out, W_in)

    # Fast path: integer-factor H upsample (incl. identity). Fold the "repeat each row
    # s times" H map into the W selector so the kernel emits one lane-dense
    # (H_in, s*W_out) slab per image with no per-row stores.
    s = H_out // H_in if (H_out % H_in == 0) else 0
    fold = s >= 1 and np.array_equal(hi, np.repeat(np.arange(H_in), s))

    if fold:
        col_src = np.tile(wi, s)                  # column j*W_out + w selects input col wi[w]
        W_cols = s * W_out
        out_kernel_shape = (NC, H_in, W_cols)     # free reshape of (NC, H_out, W_out)
        kernel = _interp_kernel_fold
    else:
        col_src = wi
        W_cols = W_out
        out_kernel_shape = (NC, H_out, W_out)
        kernel = functools.partial(_interp_kernel_general, row_runs=_row_runs(hi))

    sel = _w_selector(col_src, W_in, compute_dtype)
    # TODO(synk): for 4K-class widths, band the selector (add a W_out tile axis) and
    # single-buffer the constant selector (pipeline_mode=pl.Buffered(1)).

    # --- VMEM-driven block sizing: counts in/out double-buffers, the resident selector,
    # the f32 matmul intermediate, the astype copy and any in-kernel cast copy. ---
    budget, vmem_limit = _vmem_limits()
    itm = x.dtype.itemsize
    in_b = H_in * W_in * itm
    out_b = out_kernel_shape[1] * out_kernel_shape[2] * itm
    t_b = H_in * W_cols * 4                        # f32 matmul result
    cast_b = H_in * W_in * 4 if needs_cast else 0  # in-kernel f32 copy of the block
    per_img = 2 * in_b + 3 * out_b + t_b + cast_b  # 2x DMA buffers + astype copy of t
    sel_b = W_in * W_cols * (2 if compute_dtype == jnp.bfloat16 else 4)
    B_blk = _pick_block(NC, per_img, sel_b, budget)

    x3 = x.reshape(NC, H_in, W_in)                 # free reshape
    grid = (pl.cdiv(NC, B_blk),)                   # padded tail block if NC % B_blk != 0

    out3 = pl.pallas_call(
        kernel,
        out_shape=jax.ShapeDtypeStruct(out_kernel_shape, x.dtype),
        grid_spec=pltpu.PrefetchScalarGridSpec(
            num_scalar_prefetch=0,
            grid=grid,
            in_specs=[
                pl.BlockSpec((B_blk, H_in, W_in), lambda g: (g, 0, 0)),
                pl.BlockSpec((W_in, W_cols), lambda g: (0, 0)),
            ],
            out_specs=pl.BlockSpec((B_blk,) + out_kernel_shape[1:], lambda g: (g, 0, 0)),
        ),
        compiler_params=pltpu.CompilerParams(
            dimension_semantics=("parallel",),
            vmem_limit_bytes=int(vmem_limit),
        ),
    )(x3, sel)

    out = out3.reshape(N, C, H_out, W_out)         # free reshape (fold path layout match)
    if out.dtype != orig_dtype:
        out = out.astype(orig_dtype)
    return out


class Interpolate:
    """JAX/Pallas analogue of the PyTorch Interpolate module."""

    def __init__(self, size):
        self.size = size

    def __call__(self, x):
        return interpolate_nearest(x, self.size)


if __name__ == "__main__":
    key = jax.random.PRNGKey(0)
    N, C, H_in, W_in = 2, 4, 16, 16
    x = jax.random.normal(key, (N, C, H_in, W_in), dtype=jnp.float32)

    # 1) Integer-factor upsample (fold fast path): 16x16 -> 32x32.
    size1 = (32, 32)
    y1 = jax.block_until_ready(Interpolate(size1)(x))
    hi1 = _nearest_src_indices(size1[0], H_in)
    wi1 = _nearest_src_indices(size1[1], W_in)
    ref1 = x[:, :, hi1, :][:, :, :, wi1]
    assert y1.shape == (N, C, size1[0], size1[1]), y1.shape
    assert jnp.allclose(y1, ref1, atol=1e-6), "fold-path mismatch vs nearest reference"

    # 2) Non-integer ratio (general path): 16x16 -> 24x40.
    size2 = (24, 40)
    y2 = jax.block_until_ready(Interpolate(size2)(x))
    hi2 = _nearest_src_indices(size2[0], H_in)
    wi2 = _nearest_src_indices(size2[1], W_in)
    ref2 = x[:, :, hi2, :][:, :, :, wi2]
    assert y2.shape == (N, C, size2[0], size2[1]), y2.shape
    assert jnp.allclose(y2, ref2, atol=1e-6), "general-path mismatch vs nearest reference"

    print("KERNEL_OK")
</pallas_src>

<mosaic_0001>
module attributes {stable_mosaic.version = 11 : i64} {
  func.func @_interp_kernel_fold(%arg0: i32, %arg1: memref<2x16x16xf32, #tpu.memory_space<vmem>>, %arg2: memref<16x64xf32, #tpu.memory_space<vmem>>, %arg3: memref<2x16x64xf32, #tpu.memory_space<vmem>>) attributes {dimension_semantics = [#tpu.dimension_semantics<parallel>], iteration_bounds = array<i64: 4>, scalar_prefetch = 0 : i64, scratch_operands = 0 : i64, tpu.core_type = #tpu.core_type<tc>, window_params = [{transform_indices = @transform_0, window_bounds = array<i64: 2, 16, 16>}, {pipeline_mode = #tpu.pipeline_mode<synchronous>, transform_indices = @transform_1, window_bounds = array<i64: 16, 64>}, {transform_indices = @transform_2, window_bounds = array<i64: 2, 16, 64>}]} {
    %c0 = arith.constant 0 : index
    %c0_0 = arith.constant 0 : index
    %c0_1 = arith.constant 0 : index
    %0 = vector.load %arg1[%c0, %c0_0, %c0_1] : memref<2x16x16xf32, #tpu.memory_space<vmem>>, vector<2x16x16xf32>
    %1 = vector.shape_cast %0 : vector<2x16x16xf32> to vector<32x16xf32>
    %c0_2 = arith.constant 0 : index
    %c0_3 = arith.constant 0 : index
    %2 = vector.load %arg2[%c0_2, %c0_3] : memref<16x64xf32, #tpu.memory_space<vmem>>, vector<16x64xf32>
    %cst = arith.constant dense<0.000000e+00> : vector<32x64xf32>
    %3 = tpu.matmul %1, %2, %cst {dimension_numbers = #tpu.dot_dimension_numbers<[1], [0], [0], [1], [0, 0, 1, 1], [], []>} : vector<32x16xf32>, vector<16x64xf32>, vector<32x64xf32> -> vector<32x64xf32>
    %4 = vector.shape_cast %3 : vector<32x64xf32> to vector<2x16x64xf32>
    %c0_4 = arith.constant 0 : index
    %c0_5 = arith.constant 0 : index
    %c0_6 = arith.constant 0 : index
    %5 = vector.load %arg3[%c0_4, %c0_5, %c0_6] : memref<2x16x64xf32, #tpu.memory_space<vmem>>, vector<2x16x64xf32>
    tpu.vector_store %arg3[%c0_4, %c0_5, %c0_6], %4 {strides = array<i32>} : memref<2x16x64xf32, #tpu.memory_space<vmem>>, vector<2x16x64xf32>,
    return
  }
  func.func @transform_0(%arg0: i32) -> (i32, i32, i32) {
    %c0_i32 = arith.constant 0 : i32
    %c0_i32_0 = arith.constant 0 : i32
    %c0_i32_1 = arith.constant 0 : i32
    return %arg0, %c0_i32, %c0_i32_0 : i32, i32, i32
  }
  func.func @transform_1(%arg0: i32) -> (i32, i32) {
    %c0_i32 = arith.constant 0 : i32
    %c0_i32_0 = arith.constant 0 : i32
    %c0_i32_1 = arith.constant 0 : i32
    return %c0_i32, %c0_i32_0 : i32, i32
  }
  func.func @transform_2(%arg0: i32) -> (i32, i32, i32) {
    %c0_i32 = arith.constant 0 : i32
    %c0_i32_0 = arith.constant 0 : i32
    %c0_i32_1 = arith.constant 0 : i32
    return %arg0, %c0_i32, %c0_i32_0 : i32, i32, i32
  }
}

</mosaic_0001>

<bundles_post_ra>
// kernel: tpu_custom_call.1
= control target key start
LH: loop header
LB: loop body
LE: loop exit
PB: predicated region body
PF: predicated region fallthrough
CT: control target
= control target key end

     0   :  { %7 = vsyncpa [#allocation3], 0  ;;  %s821_s0 = inlined_call_operand.hbm [shape: f32[8,16,16], index: 0, kind: input, shape index: {}]   ;;  %s822_s1 = inlined_call_operand.hbm [shape: f32[16,64], index: 1, kind: input, shape index: {}]   ;;  %s823_s2 = inlined_call_operand.hbm [shape: f32[8,16,64], index: 2, kind: output, shape index: {}]  }
   0x1   :  { %9 = vsyncpa [#allocation3 + $0x1], 0 }
   0x2   :  { %10 = vsyncpa [#allocation6], 0 }
   0x3   :  { %11 = vsyncpa [#allocation4], 0 }
   0x4   :  { %13 = vsyncpa [#allocation4 + $0x1], 0  ;;  %s640_s9 = smov 0   ;;  %s642_s10 = smov 0  }
   0x5   :  { %s644_s11 = smov 0   ;;  %s646_s12 = smov 0  }
   0x6 LB: > { %s661_s13 = sadd.s32 4294967295, %s616_s12   ;;  %s387_s14 = sadd.s32 4294967294, %s616_s12   ;;  %s616_s12 = sphi %s646_s12, %s844_s12   ;;  %s612_s11 = sphi %s644_s11, %s843_s11   ;;  %s608_s10 = sphi %s642_s10, %s842_s10   ;;  %s604_s9 = sphi %s640_s9, %s841_s9  }
   0x7   : > { %p39_p0 = scmp.ne.s32.totalorder %s608_s10, %s604_s9  ;;  %p824_p1 = scmp.eq.s32.totalorder %s661_s13, 0 }
   0x8   : > { %p90_p3 = scmp.eq.s32.totalorder %s387_s14, 3  ;;  %p388_p5 = scmp.ge.s32.totalorder %s616_s12, 1 }
   0x9   : > { %p670_p4 = por %p824_p1, %p39_p0  ;;  %p97_p7 = scmp.lt.s32.totalorder %s616_s12, 5 }
   0xa   : > { %p675_p6 = por %p90_p3, %p39_p0  ;;  %s618_s18 = smov [#allocation5]  }
   0xb   : > { %s828_s15 = scalar_select %p670_p4, 1, 0 }
   0xc   : > { %s829_s16 = scalar_select %p675_p6, 1, 0 }
   0xd   : > { %p680_p8 = pnand %p388_p5, %p97_p7  ;;  %s109_s19 = sshll.u32 %s618_s18, 4  ;;  %s110_s19 = int_to_ptr.vmem [resolvable:$true] %s109_s19 }
   0xe   : > { %s693_s21 = sadd.s32 1, %s616_s12   ;;  %s26_s22 = sadd.s32 1, %s612_s11 }
   0xf   : > { %s830_s17 = scalar_select %p680_p8, 1, 0 }
  0x10   : > { %p441_p9 = pneg %p680_p8  ;;  %s23_s23 = ssub.s32 %s616_s12, %s693_s21 }
  0x11   : > { %s505_s24 = scalar_lea.vmem %s110_s19, 256  ;;  %p513_p3 = scmp.lt.s32.totalorder %s110_s19, %s110_s19 }
  0x12   : > { %p688_p10 = pnand %p441_p9, %p824_p1  ;;  %p506_p12 = scmp.ne.s32.totalorder %s110_s19, %s505_s24 }
  0x13   : > { %p514_p5 = scmp.lt.s32.totalorder %s505_s24, %s505_s24 }
  0x14   : > { %p496_p11 = pneg %p688_p10 }
  0x15   : > { %p515_p7 = por %p514_p5, %p513_p3 }
  0x16   : > { %p508_p13 = pnand %p506_p12, %p496_p11 }
  0x18   : > { %p509_p0 = pneg %p508_p13 }
  0x1a   : > { %p516_p2 = pnand %p515_p7, %p509_p0 }
  0x1c   : > { %519 = shalt.err (!%p516_p2)
}
  0x1d   : > { %s619_s25 = smov 128   ;;  %s620_s26 = smov 8  }
  0x1e   : > { %444 = dma.hbm_to_vmem [thread:$0]  (!%p688_p10), %s822_s1, 256, %s110_s19, [#allocation6], %s619_s25, %s619_s25, %s620_s26  }
  0x1f   : > { %p24_p2 = scmp.eq.s32.totalorder %s23_s23, 0  ;;  %p33_p9 = scmp.ne.s32.totalorder %s612_s11, %s608_s10 }
  0x20   : > { %p34_p11 = scmp.eq.s32.totalorder %s616_s12, 0  ;;  %p454_p12 = scmp.lt.s32.totalorder %s616_s12, 4 }
  0x21   : > { %s713_s29 = scalar_select %p24_p2, %s612_s11, %s26_s22  }
  0x22   : > { %p35_p13 = por %p34_p11, %p33_p9  ;;  %p832_p0 = scmp.eq.s32.totalorder %s661_s13, 3 }
  0x23   : > { %s123_s3 = sand.u32 1, %s612_s11   ;;  %s410_s4 = sshll.u32 %s616_s12, 9 }
  0x24   : > { %p717_p3 = por %p832_p0, %p33_p9  ;;  %s391_s5 = sshll.u32 %s123_s3, 5 }
  0x25   : > { %s726_s8 = scalar_lea.hbm %s821_s0, %s410_s4  ;;  %s127_s14 = scalar_lea.vmem [#allocation2], %s391_s5 }
  0x26   : > { %s833_s30 = scalar_select %p717_p3, 1, 0 }
  0x27   : > { %s135_s18 = sshll.u32 %s127_s14, 4  ;;  %p728_p10 = pnand %p454_p12, %p35_p13  ;;  %s732_s18 = int_to_ptr.vmem [resolvable:$true] %s135_s18 }
  0x28   : > { %s734_s20 = scalar_lea.sflag [#allocation3], %s123_s3  ;;  %s520_s22 = scalar_lea.hbm %s726_s8, 512 }
  0x29   : > { %p521_p5 = scmp.ne.s32.totalorder %s726_s8, %s520_s22  ;;  %p522_p7 = pneg %p728_p10 }
  0x2a   : > { %s525_s27 = scalar_lea.hbm %s821_s0, 2048  ;;  %p526_p11 = scmp.lt.s32.totalorder %s726_s8, %s821_s0 }
  0x2b   : > { %p523_p2 = pnand %p522_p7, %p521_p5  ;;  %p527_p12 = scmp.lt.s32.totalorder %s525_s27, %s520_s22 }
  0x2d   : > { %p524_p9 = pneg %p523_p2  ;;  %p528_p13 = por %p527_p12, %p526_p11 }
  0x2f   : > { %p529_p0 = pnand %p528_p13, %p524_p9 }
  0x31   : > { %532 = shalt.err (!%p529_p0)
}
  0x32   : > { %s533_s3 = scalar_lea.vmem %s732_s18, 512  ;;  %s621_s5 = smov [#allocation2]  }
  0x33   : > { %p534_p1 = scmp.ne.s32.totalorder %s732_s18, %s533_s3  ;;  %s538_s6 = sshll.u32 %s621_s5, 4  ;;  %s539_s6 = int_to_ptr.vmem [resolvable:$false] %s538_s6 }
  0x34   : > { %s540_s7 = scalar_lea.vmem %s539_s6, 1024  ;;  %p541_p2 = scmp.lt.s32.totalorder %s732_s18, %s539_s6 }
  0x35   : > { %p536_p6 = pnand %p534_p1, %p522_p7  ;;  %p542_p3 = scmp.lt.s32.totalorder %s540_s7, %s533_s3 }
  0x37   : > { %p537_p5 = pneg %p536_p6  ;;  %p543_p4 = por %p542_p3, %p541_p2 }
  0x39   : > { %p544_p8 = pnand %p543_p4, %p537_p5 }
  0x3b   : > { %547 = shalt.err (!%p544_p8)
}
  0x3c   : > { %448 = dma.hbm_to_vmem [thread:$0]  (!%p728_p10), %s726_s8, 512, %s732_s18, %s734_s20, %s619_s25, %s619_s25, %s620_s26  }
  0x3d   : > { %p835_p1 = scmp.ne.s32.totalorder %s830_s17, 0 }
  0x3e   : > { %s761_s14 = sand.u32 (!%p835_p1), 1, %s608_s10   ;;  %p836_p4 = scmp.ne.s32.totalorder (!%p835_p1), %s828_s15, 0 }
  0x3f   : > { %147 = sbr.rel (%p835_p1) target bundleno = 287 (0x11f), region = 28  ;;  %s396_s22 = sshll.u32 (!%p835_p1), %s761_s14, 5 }
  0x40   : > { %s150_s23 = scalar_lea.sflag (!%p835_p1), [#allocation3], %s761_s14  ;;  %s153_s24 = scalar_lea.vmem (!%p835_p1), [#allocation2], %s396_s22 }
  0x44   : > { %591 = dma.done.wait (%p836_p4), %s150_s23, 512  }
  0x45   : > { %593 = vsyncadd (%p836_p4), %s150_s23, 4294966784  ;;  %p837_p6 = scmp.eq.s32.totalorder %s661_s13, 0 }
  0x47   : > { %595 = dma.done.wait (%p837_p6), [#allocation6], 256   ;;  %p838_p8 = pmov %p837_p6 }
  0x48   : > { %v185_v0 = vld [vmem:[#allocation5 + $0x8] sm:$0xff]  ;;  %v184_v1 = vld [vmem:[#allocation5] sm:$0xff]  ;;  %vm186_vm0 = vcmask 130048   ;;  %v182_v3 = vld [vmem:[%s153_s24 + $0x10] sm:$0xff]  ;;  %s177_s15 = scalar_lea.vmem [#allocation7], %s396_s22  ;;  %s412_s25 = sshll.u32 %s661_s13, 9 }
  0x49   : > { %597 = vsyncadd (%p838_p8), [#allocation6], 4294967040  ;;  %419 = vmatprep.subr.mxu0 %v185_v0  ;;  %429 = vmatprep.subr.mxu1 %v185_v0  ;;  %v180_v2 = vld [vmem:[%s153_s24] sm:$0xff]  ;;  %v181_v4 = vld [vmem:[%s153_s24 + $0x8] sm:$0xff]  ;;  %s304_s17 = sshll.u32 %s177_s15, 4  ;;  %vm284_vm1 = vcmask 523264   ;;  %s779_s18 = scalar_lea.hbm %s823_s2, %s412_s25  ;;  %s774_s17 = int_to_ptr.vmem [resolvable:$true] %s304_s17 }
  0x4a   : > { %420 = vmatpush3.msra.mxu0 %v185_v0  ;;  %431 = vmatpush3.msra.mxu1 %v185_v0  ;;  %v183_v5 = vld [vmem:[%s153_s24 + $0x18] sm:$0xff]  ;;  %s290_s13 = scalar_lea.sflag [#allocation4], %s761_s14  ;;  %s548_s19 = scalar_lea.vmem %s774_s17, 512 }
  0x4b   : > { %421 = vmatprep.subr.mxu0 %v184_v1  ;;  %430 = vmatprep.subr.mxu1 %v184_v1  ;;  %p549_p3 = scmp.ne.s32.totalorder %s774_s17, %s548_s19  ;;  %p839_p10 = scmp.ne.s32.totalorder %s833_s30, 0 }
  0x4c   : > { %422 = vmatpush3.msra.mxu0 %v184_v1  ;;  %432 = vmatpush3.msra.mxu1 %v184_v1  ;;  %s622_s20 = smov [#allocation7]  }
  0x4d   : > { %423 = vmatprep.mubr.msk.f32.mxu0 %vm186_vm0, %v180_v2  ;;  %426 = vmatprep.mubr.msk.f32.mxu1 %vm186_vm0, %v182_v3  ;;  %p550_p7 = pnand %p549_p3, %p839_p10  ;;  %s552_s27 = sshll.u32 %s622_s20, 4  ;;  %s553_s27 = int_to_ptr.vmem [resolvable:$false] %s552_s27 }
  0x4e   : > { %424 = vmatmul.mubr.msk.f32.vlgmr.msra.gmra.mxu0 %vm186_vm0, %v181_v4  ;;  %427 = vmatmul.mubr.msk.f32.vlgmr.msra.gmra.mxu1 %vm186_vm0, %v183_v5  ;;  %s554_s28 = scalar_lea.vmem %s553_s27, 1024  ;;  %p555_p11 = scmp.lt.s32.totalorder %s774_s17, %s553_s27 }
  0x4f   : > { %p551_p9 = pneg %p550_p7  ;;  %p556_p12 = scmp.lt.s32.totalorder %s554_s28, %s548_s19 }
  0x51   : > { %p557_p13 = por %p556_p12, %p555_p11 }
  0x53   : > { %p558_p0 = pnand %p557_p13, %p551_p9 }
 0x10e   : > { %v425_v6 = vpop.f32.mrf.mxu0  ;;  %v428_v7 = vpop.f32.mrf.mxu1 }
 0x10f   : > { %286 = vst.msk [vmem:[%s177_s15 + $0x8] sm:$0xff] %vm284_vm1, %v425_v6  ;;  %288 = vst.msk [vmem:[%s177_s15 + $0x18] sm:$0xff] %vm284_vm1, %v428_v7 }
 0x110   : > { %v265_v8 = vpop.f32.mrf.mxu0  ;;  %v275_v9 = vpop.f32.mrf.mxu1 }
 0x111   : > { %285 = vst.msk [vmem:[%s177_s15] sm:$0xff] %vm284_vm1, %v265_v8  ;;  %287 = vst.msk [vmem:[%s177_s15 + $0x10] sm:$0xff] %vm284_vm1, %v275_v9 }
 0x112   : > { %561 = shalt.err (!%p558_p0)
}
 0x113   : > { %s562_s4 = scalar_lea.hbm %s779_s18, 512  ;;  %s566_s6 = scalar_lea.hbm %s823_s2, 2048 }
 0x114   : > { %p563_p5 = scmp.ne.s32.totalorder %s779_s18, %s562_s4  ;;  %p567_p4 = scmp.lt.s32.totalorder %s779_s18, %s823_s2 }
 0x115   : > { %p568_p6 = scmp.lt.s32.totalorder %s566_s6, %s562_s4 }
 0x116   : > { %p564_p2 = pnand %p563_p5, %p839_p10 }
 0x117   : > { %p569_p8 = por %p568_p6, %p567_p4 }
 0x118   : > { %p565_p1 = pneg %p564_p2 }
 0x11a   : > { %p570_p3 = pnand %p569_p8, %p565_p1 }
 0x11c   : > { %573 = shalt.err (!%p570_p3)
}
 0x11d   : > { %s623_s23 = smov 128   ;;  %s624_s24 = smov 8  }
 0x11e   : > { %439 = dma.vmem_to_hbm [thread:$0]  (%p839_p10), %s774_s17, 512, %s779_s18, %s290_s13, %s623_s23, %s623_s23, %s624_s24  }
 0x11f PF: > { %p456_p7 = scmp.ge.s32.totalorder %s616_s12, 2  ;;  %s319_s15 = sand.u32 1, %s604_s9  }
 0x120   : > { %p840_p9 = scmp.ne.s32.totalorder %s829_s16, 0  ;;  %s320_s25 = scalar_lea.sflag [#allocation4], %s319_s15 }
 0x122   : > { %p450_p11 = pnand %p456_p7, %p840_p9 }
 0x124   : > { %p451_p12 = pneg %p450_p11 }
 0x126   : > { %599 = dma.done.wait (%p451_p12), %s320_s25, 512  }
 0x127   : > { %601 = vsyncadd (%p451_p12), %s320_s25, 4294966784  ;;  %p16_p13 = scmp.ge.s32.totalorder %s693_s21, 6   ;;  %s841_s9 = smov %s608_s10 }
 0x128   : > { %s842_s10 = smov %s612_s11  ;;  %s843_s11 = smov %s713_s29 }
 0x129   : > { %s844_s12 = smov %s693_s21  ;;  %18 = sbr.rel (!%p16_p13) target bundleno = 6 (0x6), region = 77 }
 0x12e   :  { %325 = vsyncpa [#allocation3], 1 }
 0x12f   :  { %327 = vsyncpa [#allocation3 + $0x1], 1 }
 0x130   :  { %328 = vsyncpa [#allocation6], 1 }
 0x131   :  { %329 = vsyncpa [#allocation4], 1 }
 0x132   :  { %331 = vsyncpa [#allocation4 + $0x1], 1 }

</bundles_post_ra>
